<compile_context>
chip_gen: v5e
topology: v5e:2x2
jax: 0.10.0
libtpu: 0.0.40
codegen_flags: <defaults>
</compile_context>

<pallas_src>
import functools

import jax
import jax.numpy as jnp
from jax.experimental import pallas as pl
from jax.experimental.pallas import tpu as pltpu


def _conv_relu_kernel(w_ref, x_ref, o_ref, *, th, W, KH, KW):
    """One (batch n, row-tile t) step: fused im2col + matmul + ReLU.

    w_ref: (KH*KW, O, C)  per-tap weight matrices (w[k, o, c] = weight[o, c, ky, kx])
    x_ref: (C, Hp, Wp)    whole reflect-padded image for batch element n
    o_ref: (O, th*W)      lane-dense output tile (output rows [t*th, (t+1)*th))
    """
    t = pl.program_id(1)
    C = x_ref.shape[0]
    O, T = o_ref.shape                       # T = th * W
    row0 = t * th
    acc = jnp.zeros((O, T), dtype=jnp.float32)
    for ky in range(KH):
        for kx in range(KW):
            # tap[c, r, w] = x_pad[c, row0 + r + ky, w + kx]
            tap = x_ref[:, pl.ds(row0 + ky, th), pl.ds(kx, W)]   # (C, th, W)
            tap = tap.reshape(C, T)                              # VMEM relayout only
            acc = acc + jnp.dot(w_ref[ky * KW + kx], tap,
                                preferred_element_type=jnp.float32)
    o_ref[...] = jnp.maximum(acc, 0.0).astype(o_ref.dtype)       # ReLU epilogue


def _pick_row_tile(H, W, C, O, Hp, Wp, KK, N, *, itemsize=4,
                   vmem_budget=24 << 20, lane_cap=2048, min_steps=4):
    """Pick th (output rows per tile), th | H.

    Hard constraints: th*W % 128 == 0 or th == H (TPU (8,128) block rule for the
    lane-dense output block), and double-buffered blocks fit the VMEM budget.
    Preference: enough total grid steps to occupy both v7x TensorCores
    (N * H/th >= min_steps), then the largest lane tile up to lane_cap.
    """
    base_bytes = 2 * (C * Hp * Wp + KK * O * C) * itemsize   # x + weights, dbl-buffered

    def fits(th):
        return base_bytes + 2 * O * th * W * itemsize <= vmem_budget

    divisors = [d for d in range(1, H + 1) if H % d == 0]
    valid = [d for d in divisors
             if ((d * W) % 128 == 0 or d == H) and d * W <= lane_cap and fits(d)]
    if not valid:
        # TODO(synk): cdiv grid + masked last tile for shapes where no divisor
        # of H gives a 128-multiple lane tile under the VMEM budget.
        return H

    def key(th):
        steps_ok = (N * (H // th)) >= min_steps
        return (steps_ok, th * W)

    return max(valid, key=key)


@functools.partial(jax.jit, static_argnames=("kernel_size",))
def basic_conv_forward(x_nchw, weight_oihw, *, kernel_size):
    """BasicConv forward: reflect-pad Conv2d (stride=1, no bias) + ReLU.

    x_nchw:      (N, C, H, W)   float32
    weight_oihw: (O, C, KH, KW) float32
    returns:     (N, O, H, W)   float32
    """
    N, C, H, W = x_nchw.shape
    O = weight_oihw.shape[0]
    KH = KW = kernel_size
    assert kernel_size % 2 == 1, "reflect padding path assumes odd kernel_size"
    pad = kernel_size // 2
    assert H > pad and W > pad, "reflect padding requires H, W > kernel_size // 2"
    Hp, Wp = H + 2 * pad, W + 2 * pad
    HW = H * W
    itemsize = x_nchw.dtype.itemsize

    # --- glue (plain JAX, stays NCHW; no im2col materialization) ---
    x_pad = jnp.pad(x_nchw, ((0, 0), (0, 0), (pad, pad), (pad, pad)),
                    mode="reflect")                               # PyTorch 'reflect'
    # per-tap weight matrices: w_taps[ky*KW + kx, o, c] = weight[o, c, ky, kx]
    w_taps = jnp.transpose(weight_oihw, (2, 3, 0, 1)).reshape(KH * KW, O, C)

    th = _pick_row_tile(H, W, C, O, Hp, Wp, KH * KW, N, itemsize=itemsize)
    T = th * W
    num_t = H // th

    block_bytes = 2 * (C * Hp * Wp + O * T + KH * KW * O * C) * itemsize
    vmem_limit = int(min(48 << 20, max(2 * block_bytes, 16 << 20)))

    kernel = functools.partial(_conv_relu_kernel, th=th, W=W, KH=KH, KW=KW)

    cost = pl.CostEstimate(
        flops=2 * N * O * C * KH * KW * HW,
        transcendentals=0,
        bytes_accessed=(N * C * Hp * Wp + KH * KW * O * C + N * O * HW) * itemsize)

    out_flat = pl.pallas_call(
        kernel,
        out_shape=jax.ShapeDtypeStruct((N, O, HW), x_nchw.dtype),
        grid_spec=pltpu.PrefetchScalarGridSpec(
            num_scalar_prefetch=0,
            grid=(N, num_t),
            in_specs=[
                # per-tap weights: same (full) block for every grid step
                pl.BlockSpec((KH * KW, O, C), lambda n, t: (0, 0, 0)),
                # whole reflect-padded image of batch element n (batch squeezed);
                # block index ignores t, so it is DMA'd once per n
                pl.BlockSpec((None, C, Hp, Wp), lambda n, t: (n, 0, 0, 0)),
            ],
            out_specs=pl.BlockSpec((None, O, T), lambda n, t: (n, 0, t)),
        ),
        compiler_params=pltpu.CompilerParams(
            dimension_semantics=("parallel", "parallel"),
            vmem_limit_bytes=vmem_limit),
        cost_estimate=cost,
    )(w_taps, x_pad)

    # contiguous reshape only — already NCHW order, no transpose
    return out_flat.reshape(N, O, H, W)


if __name__ == "__main__":
    # BasicConv(in_channel=4, out_channel=8, kernel_size=3, stride=1,
    #           bias=False, norm=False, relu=True, transpose=False)
    N, C_in, H, W = 2, 4, 16, 16
    C_out, Ksz = 8, 3

    key = jax.random.PRNGKey(0)
    k_x, k_w = jax.random.split(key)
    x = jax.random.normal(k_x, (N, C_in, H, W), dtype=jnp.float32)
    # same shape as nn.Conv2d.weight: (O, I, KH, KW)
    weight = 0.1 * jax.random.normal(k_w, (C_out, C_in, Ksz, Ksz),
                                     dtype=jnp.float32)

    out = basic_conv_forward(x, weight, kernel_size=Ksz)
    out = jax.block_until_ready(out)

    # sanity check against XLA's conv (reflect pad + conv + relu)
    x_pad_ref = jnp.pad(x, ((0, 0), (0, 0), (1, 1), (1, 1)), mode="reflect")
    ref = jax.lax.conv_general_dilated(
        x_pad_ref, weight, window_strides=(1, 1), padding="VALID",
        dimension_numbers=("NCHW", "OIHW", "NCHW"))
    ref = jnp.maximum(ref, 0.0)
    assert out.shape == (N, C_out, H, W)
    assert jnp.allclose(out, ref, atol=1e-5, rtol=1e-5)

    print("KERNEL_OK")
</pallas_src>

<mosaic_0001>
module attributes {stable_mosaic.version = 11 : i64} {
  func.func @_conv_relu_kernel(%arg0: i32, %arg1: i32, %arg2: memref<9x8x4xf32, #tpu.memory_space<vmem>>, %arg3: memref<1x4x18x18xf32, #tpu.memory_space<vmem>>, %arg4: memref<1x8x128xf32, #tpu.memory_space<vmem>>) attributes {dimension_semantics = [#tpu.dimension_semantics<parallel>, #tpu.dimension_semantics<parallel>], iteration_bounds = array<i64: 2, 2>, scalar_prefetch = 0 : i64, scratch_operands = 0 : i64, tpu.core_type = #tpu.core_type<tc>, window_params = [{pipeline_mode = #tpu.pipeline_mode<synchronous>, transform_indices = @transform_0, window_bounds = array<i64: 9, 8, 4>}, {transform_indices = @transform_1, window_bounds = array<i64: 1, 4, 18, 18>}, {transform_indices = @transform_2, window_bounds = array<i64: 1, 8, 128>}]} {
    %c8_i32 = arith.constant 8 : i32
    %0 = arith.muli %arg1, %c8_i32 : i32
    %cst = arith.constant 0.000000e+00 : f32
    %1 = vector.broadcast %cst : f32 to vector<8x128xf32>
    %c0_i32 = arith.constant 0 : i32
    %2 = arith.addi %0, %c0_i32 : i32
    %c0 = arith.constant 0 : index
    %c0_0 = arith.constant 0 : index
    %3 = arith.index_cast %2 : i32 to index
    %c0_1 = arith.constant 0 : index
    %4 = vector.load %arg3[%c0, %c0_0, %3, %c0_1] : memref<1x4x18x18xf32, #tpu.memory_space<vmem>>, vector<1x4x8x16xf32>
    %5 = vector.shape_cast %4 : vector<1x4x8x16xf32> to vector<4x8x16xf32>
    %6 = vector.shape_cast %5 : vector<4x8x16xf32> to vector<4x128xf32>
    %c0_2 = arith.constant 0 : index
    %c0_3 = arith.constant 0 : index
    %c0_4 = arith.constant 0 : index
    %7 = vector.load %arg2[%c0_2, %c0_3, %c0_4] : memref<9x8x4xf32, #tpu.memory_space<vmem>>, vector<1x8x4xf32>
    %8 = vector.shape_cast %7 : vector<1x8x4xf32> to vector<8x4xf32>
    %cst_5 = arith.constant dense<0.000000e+00> : vector<8x128xf32>
    %9 = tpu.matmul %8, %6, %cst_5 {dimension_numbers = #tpu.dot_dimension_numbers<[1], [0], [0], [1], [0, 0, 1, 1], [], []>} : vector<8x4xf32>, vector<4x128xf32>, vector<8x128xf32> -> vector<8x128xf32>
    %10 = arith.addf %1, %9 : vector<8x128xf32>
    %c0_i32_6 = arith.constant 0 : i32
    %11 = arith.addi %0, %c0_i32_6 : i32
    %c0_7 = arith.constant 0 : index
    %c0_8 = arith.constant 0 : index
    %12 = arith.index_cast %11 : i32 to index
    %c1 = arith.constant 1 : index
    %13 = vector.load %arg3[%c0_7, %c0_8, %12, %c1] : memref<1x4x18x18xf32, #tpu.memory_space<vmem>>, vector<1x4x8x16xf32>
    %14 = vector.shape_cast %13 : vector<1x4x8x16xf32> to vector<4x8x16xf32>
    %15 = vector.shape_cast %14 : vector<4x8x16xf32> to vector<4x128xf32>
    %c1_9 = arith.constant 1 : index
    %c0_10 = arith.constant 0 : index
    %c0_11 = arith.constant 0 : index
    %16 = vector.load %arg2[%c1_9, %c0_10, %c0_11] : memref<9x8x4xf32, #tpu.memory_space<vmem>>, vector<1x8x4xf32>
    %17 = vector.shape_cast %16 : vector<1x8x4xf32> to vector<8x4xf32>
    %cst_12 = arith.constant dense<0.000000e+00> : vector<8x128xf32>
    %18 = tpu.matmul %17, %15, %cst_12 {dimension_numbers = #tpu.dot_dimension_numbers<[1], [0], [0], [1], [0, 0, 1, 1], [], []>} : vector<8x4xf32>, vector<4x128xf32>, vector<8x128xf32> -> vector<8x128xf32>
    %19 = arith.addf %10, %18 : vector<8x128xf32>
    %c0_i32_13 = arith.constant 0 : i32
    %20 = arith.addi %0, %c0_i32_13 : i32
    %c0_14 = arith.constant 0 : index
    %c0_15 = arith.constant 0 : index
    %21 = arith.index_cast %20 : i32 to index
    %c2 = arith.constant 2 : index
    %22 = vector.load %arg3[%c0_14, %c0_15, %21, %c2] : memref<1x4x18x18xf32, #tpu.memory_space<vmem>>, vector<1x4x8x16xf32>
    %23 = vector.shape_cast %22 : vector<1x4x8x16xf32> to vector<4x8x16xf32>
    %24 = vector.shape_cast %23 : vector<4x8x16xf32> to vector<4x128xf32>
    %c2_16 = arith.constant 2 : index
    %c0_17 = arith.constant 0 : index
    %c0_18 = arith.constant 0 : index
    %25 = vector.load %arg2[%c2_16, %c0_17, %c0_18] : memref<9x8x4xf32, #tpu.memory_space<vmem>>, vector<1x8x4xf32>
    %26 = vector.shape_cast %25 : vector<1x8x4xf32> to vector<8x4xf32>
    %cst_19 = arith.constant dense<0.000000e+00> : vector<8x128xf32>
    %27 = tpu.matmul %26, %24, %cst_19 {dimension_numbers = #tpu.dot_dimension_numbers<[1], [0], [0], [1], [0, 0, 1, 1], [], []>} : vector<8x4xf32>, vector<4x128xf32>, vector<8x128xf32> -> vector<8x128xf32>
    %28 = arith.addf %19, %27 : vector<8x128xf32>
    %c1_i32 = arith.constant 1 : i32
    %29 = arith.addi %0, %c1_i32 : i32
    %c0_20 = arith.constant 0 : index
    %c0_21 = arith.constant 0 : index
    %30 = arith.index_cast %29 : i32 to index
    %c0_22 = arith.constant 0 : index
    %31 = vector.load %arg3[%c0_20, %c0_21, %30, %c0_22] : memref<1x4x18x18xf32, #tpu.memory_space<vmem>>, vector<1x4x8x16xf32>
    %32 = vector.shape_cast %31 : vector<1x4x8x16xf32> to vector<4x8x16xf32>
    %33 = vector.shape_cast %32 : vector<4x8x16xf32> to vector<4x128xf32>
    %c3 = arith.constant 3 : index
    %c0_23 = arith.constant 0 : index
    %c0_24 = arith.constant 0 : index
    %34 = vector.load %arg2[%c3, %c0_23, %c0_24] : memref<9x8x4xf32, #tpu.memory_space<vmem>>, vector<1x8x4xf32>
    %35 = vector.shape_cast %34 : vector<1x8x4xf32> to vector<8x4xf32>
    %cst_25 = arith.constant dense<0.000000e+00> : vector<8x128xf32>
    %36 = tpu.matmul %35, %33, %cst_25 {dimension_numbers = #tpu.dot_dimension_numbers<[1], [0], [0], [1], [0, 0, 1, 1], [], []>} : vector<8x4xf32>, vector<4x128xf32>, vector<8x128xf32> -> vector<8x128xf32>
    %37 = arith.addf %28, %36 : vector<8x128xf32>
    %c1_i32_26 = arith.constant 1 : i32
    %38 = arith.addi %0, %c1_i32_26 : i32
    %c0_27 = arith.constant 0 : index
    %c0_28 = arith.constant 0 : index
    %39 = arith.index_cast %38 : i32 to index
    %c1_29 = arith.constant 1 : index
    %40 = vector.load %arg3[%c0_27, %c0_28, %39, %c1_29] : memref<1x4x18x18xf32, #tpu.memory_space<vmem>>, vector<1x4x8x16xf32>
    %41 = vector.shape_cast %40 : vector<1x4x8x16xf32> to vector<4x8x16xf32>
    %42 = vector.shape_cast %41 : vector<4x8x16xf32> to vector<4x128xf32>
    %c4 = arith.constant 4 : index
    %c0_30 = arith.constant 0 : index
    %c0_31 = arith.constant 0 : index
    %43 = vector.load %arg2[%c4, %c0_30, %c0_31] : memref<9x8x4xf32, #tpu.memory_space<vmem>>, vector<1x8x4xf32>
    %44 = vector.shape_cast %43 : vector<1x8x4xf32> to vector<8x4xf32>
    %cst_32 = arith.constant dense<0.000000e+00> : vector<8x128xf32>
    %45 = tpu.matmul %44, %42, %cst_32 {dimension_numbers = #tpu.dot_dimension_numbers<[1], [0], [0], [1], [0, 0, 1, 1], [], []>} : vector<8x4xf32>, vector<4x128xf32>, vector<8x128xf32> -> vector<8x128xf32>
    %46 = arith.addf %37, %45 : vector<8x128xf32>
    %c1_i32_33 = arith.constant 1 : i32
    %47 = arith.addi %0, %c1_i32_33 : i32
    %c0_34 = arith.constant 0 : index
    %c0_35 = arith.constant 0 : index
    %48 = arith.index_cast %47 : i32 to index
    %c2_36 = arith.constant 2 : index
    %49 = vector.load %arg3[%c0_34, %c0_35, %48, %c2_36] : memref<1x4x18x18xf32, #tpu.memory_space<vmem>>, vector<1x4x8x16xf32>
    %50 = vector.shape_cast %49 : vector<1x4x8x16xf32> to vector<4x8x16xf32>
    %51 = vector.shape_cast %50 : vector<4x8x16xf32> to vector<4x128xf32>
    %c5 = arith.constant 5 : index
    %c0_37 = arith.constant 0 : index
    %c0_38 = arith.constant 0 : index
    %52 = vector.load %arg2[%c5, %c0_37, %c0_38] : memref<9x8x4xf32, #tpu.memory_space<vmem>>, vector<1x8x4xf32>
    %53 = vector.shape_cast %52 : vector<1x8x4xf32> to vector<8x4xf32>
    %cst_39 = arith.constant dense<0.000000e+00> : vector<8x128xf32>
    %54 = tpu.matmul %53, %51, %cst_39 {dimension_numbers = #tpu.dot_dimension_numbers<[1], [0], [0], [1], [0, 0, 1, 1], [], []>} : vector<8x4xf32>, vector<4x128xf32>, vector<8x128xf32> -> vector<8x128xf32>
    %55 = arith.addf %46, %54 : vector<8x128xf32>
    %c2_i32 = arith.constant 2 : i32
    %56 = arith.addi %0, %c2_i32 : i32
    %c0_40 = arith.constant 0 : index
    %c0_41 = arith.constant 0 : index
    %57 = arith.index_cast %56 : i32 to index
    %c0_42 = arith.constant 0 : index
    %58 = vector.load %arg3[%c0_40, %c0_41, %57, %c0_42] : memref<1x4x18x18xf32, #tpu.memory_space<vmem>>, vector<1x4x8x16xf32>
    %59 = vector.shape_cast %58 : vector<1x4x8x16xf32> to vector<4x8x16xf32>
    %60 = vector.shape_cast %59 : vector<4x8x16xf32> to vector<4x128xf32>
    %c6 = arith.constant 6 : index
    %c0_43 = arith.constant 0 : index
    %c0_44 = arith.constant 0 : index
    %61 = vector.load %arg2[%c6, %c0_43, %c0_44] : memref<9x8x4xf32, #tpu.memory_space<vmem>>, vector<1x8x4xf32>
    %62 = vector.shape_cast %61 : vector<1x8x4xf32> to vector<8x4xf32>
    %cst_45 = arith.constant dense<0.000000e+00> : vector<8x128xf32>
    %63 = tpu.matmul %62, %60, %cst_45 {dimension_numbers = #tpu.dot_dimension_numbers<[1], [0], [0], [1], [0, 0, 1, 1], [], []>} : vector<8x4xf32>, vector<4x128xf32>, vector<8x128xf32> -> vector<8x128xf32>
    %64 = arith.addf %55, %63 : vector<8x128xf32>
    %c2_i32_46 = arith.constant 2 : i32
    %65 = arith.addi %0, %c2_i32_46 : i32
    %c0_47 = arith.constant 0 : index
    %c0_48 = arith.constant 0 : index
    %66 = arith.index_cast %65 : i32 to index
    %c1_49 = arith.constant 1 : index
    %67 = vector.load %arg3[%c0_47, %c0_48, %66, %c1_49] : memref<1x4x18x18xf32, #tpu.memory_space<vmem>>, vector<1x4x8x16xf32>
    %68 = vector.shape_cast %67 : vector<1x4x8x16xf32> to vector<4x8x16xf32>
    %69 = vector.shape_cast %68 : vector<4x8x16xf32> to vector<4x128xf32>
    %c7 = arith.constant 7 : index
    %c0_50 = arith.constant 0 : index
    %c0_51 = arith.constant 0 : index
    %70 = vector.load %arg2[%c7, %c0_50, %c0_51] : memref<9x8x4xf32, #tpu.memory_space<vmem>>, vector<1x8x4xf32>
    %71 = vector.shape_cast %70 : vector<1x8x4xf32> to vector<8x4xf32>
    %cst_52 = arith.constant dense<0.000000e+00> : vector<8x128xf32>
    %72 = tpu.matmul %71, %69, %cst_52 {dimension_numbers = #tpu.dot_dimension_numbers<[1], [0], [0], [1], [0, 0, 1, 1], [], []>} : vector<8x4xf32>, vector<4x128xf32>, vector<8x128xf32> -> vector<8x128xf32>
    %73 = arith.addf %64, %72 : vector<8x128xf32>
    %c2_i32_53 = arith.constant 2 : i32
    %74 = arith.addi %0, %c2_i32_53 : i32
    %c0_54 = arith.constant 0 : index
    %c0_55 = arith.constant 0 : index
    %75 = arith.index_cast %74 : i32 to index
    %c2_56 = arith.constant 2 : index
    %76 = vector.load %arg3[%c0_54, %c0_55, %75, %c2_56] : memref<1x4x18x18xf32, #tpu.memory_space<vmem>>, vector<1x4x8x16xf32>
    %77 = vector.shape_cast %76 : vector<1x4x8x16xf32> to vector<4x8x16xf32>
    %78 = vector.shape_cast %77 : vector<4x8x16xf32> to vector<4x128xf32>
    %c8 = arith.constant 8 : index
    %c0_57 = arith.constant 0 : index
    %c0_58 = arith.constant 0 : index
    %79 = vector.load %arg2[%c8, %c0_57, %c0_58] : memref<9x8x4xf32, #tpu.memory_space<vmem>>, vector<1x8x4xf32>
    %80 = vector.shape_cast %79 : vector<1x8x4xf32> to vector<8x4xf32>
    %cst_59 = arith.constant dense<0.000000e+00> : vector<8x128xf32>
    %81 = tpu.matmul %80, %78, %cst_59 {dimension_numbers = #tpu.dot_dimension_numbers<[1], [0], [0], [1], [0, 0, 1, 1], [], []>} : vector<8x4xf32>, vector<4x128xf32>, vector<8x128xf32> -> vector<8x128xf32>
    %82 = arith.addf %73, %81 : vector<8x128xf32>
    %cst_60 = arith.constant 0.000000e+00 : f32
    %83 = vector.broadcast %cst_60 : f32 to vector<8x128xf32>
    %84 = arith.maximumf %82, %83 : vector<8x128xf32>
    %c0_61 = arith.constant 0 : index
    %c0_62 = arith.constant 0 : index
    %c0_63 = arith.constant 0 : index
    %85 = vector.load %arg4[%c0_61, %c0_62, %c0_63] : memref<1x8x128xf32, #tpu.memory_space<vmem>>, vector<1x8x128xf32>
    %86 = vector.shape_cast %85 : vector<1x8x128xf32> to vector<8x128xf32>
    %87 = vector.shape_cast %84 : vector<8x128xf32> to vector<1x8x128xf32>
    tpu.vector_store %arg4[%c0_61, %c0_62, %c0_63], %87 {strides = array<i32>} : memref<1x8x128xf32, #tpu.memory_space<vmem>>, vector<1x8x128xf32>,
    return
  }
  func.func @transform_0(%arg0: i32, %arg1: i32) -> (i32, i32, i32) {
    %c0_i32 = arith.constant 0 : i32
    %c0_i32_0 = arith.constant 0 : i32
    %c0_i32_1 = arith.constant 0 : i32
    %c0_i32_2 = arith.constant 0 : i32
    return %c0_i32, %c0_i32_0, %c0_i32_1 : i32, i32, i32
  }
  func.func @transform_1(%arg0: i32, %arg1: i32) -> (i32, i32, i32, i32) {
    %c0_i32 = arith.constant 0 : i32
    %c0_i32_0 = arith.constant 0 : i32
    %c0_i32_1 = arith.constant 0 : i32
    %c0_i32_2 = arith.constant 0 : i32
    return %arg0, %c0_i32, %c0_i32_0, %c0_i32_1 : i32, i32, i32, i32
  }
  func.func @transform_2(%arg0: i32, %arg1: i32) -> (i32, i32, i32) {
    %c0_i32 = arith.constant 0 : i32
    %c0_i32_0 = arith.constant 0 : i32
    return %arg0, %c0_i32, %arg1 : i32, i32, i32
  }
}

</mosaic_0001>

<bundles_post_ra>
// kernel: basic_conv_forward.1
= control target key start
LH: loop header
LB: loop body
LE: loop exit
PB: predicated region body
PF: predicated region fallthrough
CT: control target
= control target key end

     0   :  { %s1656_s9 = smov 0   ;;  %s1658_s10 = smov 0   ;;  %s2305_s0 = inlined_call_operand.vmem [shape: f32[9,8,4], index: 0, kind: input, shape index: {}]   ;;  %s2306_s1 = inlined_call_operand.vmem [shape: f32[2,4,18,18], index: 1, kind: input, shape index: {}]   ;;  %s2307_s2 = inlined_call_operand.vmem [shape: f32[2,8,256], index: 2, kind: output, shape index: {}]  }
   0x1   :  { %s1660_s11 = smov 0   ;;  %s1662_s12 = smov 0  }
   0x2   :  { %s1664_s13 = smov 0  }
   0x3 LB: > { %s21_s14 = sadd.s32 1, %s1620_s11  ;;  %s24_s15 = sadd.s32 1, %s1624_s12  ;;  %s1628_s13 = sphi %s1664_s13, %s12_s13   ;;  %s1624_s12 = sphi %s1662_s12, %s2311_s12   ;;  %s1620_s11 = sphi %s1660_s11, %s2310_s11   ;;  %s1616_s10 = sphi %s1658_s10, %s2309_s10   ;;  %s1612_s9 = sphi %s1656_s9, %s2308_s9  }
   0x4   : > { %p22_p0 = scmp.ge.s32.totalorder %s21_s14, 2  ;;  %p1479_p1 = scmp.ge.s32.totalorder %s1628_s13, 1 }
   0x5   : > { %p126_p2 = scmp.lt.s32.totalorder %s1628_s13, 5 }
   0x6   : > { %s2313_s14 = smov (%p22_p0, %s21_s14), 0  ;;  %s2315_s15 = smov (!%p22_p0, %s24_s15), %s1624_s12 }
   0x7   : > { %p127_p3 = pnand %p1479_p1, %p126_p2  ;;  %p26_p4 = scmp.ge.s32.totalorder %s2315_s15, 2 }
   0x8   : > { %p151_p5 = scmp.lt.s32.totalorder (!%p127_p3), %s1616_s10, 1  ;;  %s1483_s17 = sshll.u32 (!%p127_p3), %s1612_s9, 3 }
   0x9   : > { %s2317_s15 = smov (%p26_p4, %s2315_s15), 0  ;;  %130 = sbr.rel (%p127_p3) target bundleno = 554 (0x22a), region = 28 }
   0xa   : > { %s1631_s22 = smov (!%p127_p3), 126   ;;  %s1633_s23 = smov (!%p127_p3), 127  }
   0xb   : > { %s1634_s24 = smov (!%p127_p3), 64   ;;  %s1635_s25 = smov (!%p127_p3), 32  }
   0xc   : > { %s1636_s26 = smov (!%p127_p3), 80   ;;  %s1637_s27 = smov (!%p127_p3), 48  }
   0xd   : > { %s1638_s28 = smov (!%p127_p3), 16   ;;  %s1639_s29 = smov (!%p127_p3), 96  }
   0xe   : > { %s2319_s10 = smov (!%p151_p5, %s1616_s10), 1  ;;  %v1630_v0 = vmov 1983009808   ;;  %vm171_vm0 = vcmask 1047556   ;;  %v1632_v10 = vmov 1934713408  }
   0xf   : > { %s1538_s16 = smul.u32 96, %s2319_s10  ;;  %v176_v1 = vunpack.c.l.s4 %v1630_v0  ;;  %v200_v11 = vunpack.c.l.s4 %v1632_v10  ;;  %s1640_s30 = smov 112   ;;  %vm255_vm1 = vcmask 130048   ;;  %vm257_vm2 = vcmask 261120  }
  0x10   : > { %vm259_vm3 = vcmask 392192   ;;  %vm261_vm4 = vcmask 523264   ;;  %vm263_vm5 = vcmask 654336   ;;  %vm265_vm6 = vcmask 785408   ;;  %p158_p6 = scmp.lt.s32.totalorder %s1612_s9, 1 }
  0x11   : > { %s155_s20 = scalar_lea.vmem %s2306_s1, %s1538_s16  ;;  %v1699_v4 = vunpack.c.0.s8 %v176_v1  ;;  %v1718_v21 = vunpack.c.0.s8 %v200_v11  ;;  %vm267_vm7 = vcmask 916480   ;;  %vm383_vm8 = vcmask 1043456  }
  0x12   : > { %s1695_s21 = scalar_lea.vmem %s155_s20, %s1483_s17  ;;  %vm379_vm9 = vcmask 31744   ;;  %s2321_s9 = smov (!%p158_p6, %s1612_s9), 1 }
  0x13   : > { %v434_v2 = vld [vmem:[%s1695_s21 + $0x18] sm:$0xff]  ;;  %v436_v3 = vld [vmem:[%s1695_s21 + $0x48] sm:$0xff]  ;;  %v435_v5 = vld [vmem:[%s1695_s21 + $0x30] sm:$0xff] }
  0x14   : > { %443 = vrot.lane.b32.xlu1 %v434_v2, %s1631_s22  ;;  %447 = vrot.lane.b32.xlu2 %v436_v3, %s1631_s22  ;;  %v183_v6 = vrot.slane %v436_v3, 4  ;;  %v185_v7 = vrot.slane %v434_v2, 4  ;;  %v166_v8 = vld [vmem:[%s1695_s21] sm:$0xff]  ;;  %v170_v9 = vrot.slane %v435_v5, 4  ;;  %v1744_v37 = vld [vmem:[%s1695_s21 + $0x4a] sm:$0xff] }
  0x15   : > { %280 = vrot.lane.b32.xlu0 %v436_v3, %s1633_s23  ;;  %v173_v12 = vrot.slane %v166_v8, 4  ;;  %v1503_v38 = vld [vmem:[%s1695_s21 + $0x49] sm:$0xff]  ;;  %v1502_v39 = vld [vmem:[%s1695_s21 + $0x31] sm:$0xff]  ;;  %v1501_v40 = vld [vmem:[%s1695_s21 + $0x19] sm:$0xff]  ;;  %v997_v59 = vrot.slane %v1744_v37, 4 }
  0x16   : > { %v184_v13 = vsel %vm171_vm0, %v183_v6, %v434_v2  ;;  %v186_v14 = vsel %vm171_vm0, %v436_v3, %v185_v7  ;;  %v172_v15 = vsel %vm171_vm0, %v170_v9, %v166_v8  ;;  %v1757_v41 = vld [vmem:[%s1695_s21 + $0x32] sm:$0xff]  ;;  %v1760_v42 = vld [vmem:[%s1695_s21 + $0x1a] sm:$0xff]  ;;  %v1769_v44 = vld [vmem:[%s1695_s21 + $0x2] sm:$0xff]  ;;  %v591_v45 = vrot.slane %v1503_v38, 4 }
  0x17   : > { %v1710_v16 = vperm.slane %v186_v14, %v1699_v4  ;;  %v174_v17 = vsel %vm171_vm0, %v435_v5, %v173_v12  ;;  %v178_v18 = vperm.slane %v172_v15, %v1699_v4  ;;  %v190_v19 = vperm.slane %v184_v13, %v1699_v4  ;;  %v1507_v43 = vld [vmem:[%s1695_s21 + $0x1] sm:$0xff] }
  0x18   : > { %v1716_v20 = vperm.slane %v174_v17, %v1699_v4  ;;  %v579_v46 = vrot.slane %v1502_v39, 4  ;;  %v581_v47 = vrot.slane %v1507_v43, 4  ;;  %v592_v48 = vsel %vm171_vm0, %v591_v45, %v1501_v40 }
  0x19   : > { %v207_v22 = vrot.slane %v1710_v16, 4  ;;  %v197_v23 = vrot.slane %v178_v18, 4  ;;  %v195_v24 = vrot.slane %v190_v19, 4  ;;  %v598_v50 = vperm.slane %v592_v48, %v1699_v4 }
  0x1a   : > { %v580_v49 = vsel %vm171_vm0, %v579_v46, %v1507_v43  ;;  %v582_v51 = vsel %vm171_vm0, %v1502_v39, %v581_v47  ;;  %v593_v52 = vrot.slane %v1501_v40, 4  ;;  %v985_v61 = vrot.slane %v1757_v41, 4 }
  0x1b   : > { %v208_v25 = vsel %vm171_vm0, %v207_v22, %v1716_v20  ;;  %v198_v26 = vsel %vm171_vm0, %v190_v19, %v197_v23  ;;  %v196_v27 = vsel %vm171_vm0, %v195_v24, %v178_v18  ;;  %v590_v53 = vperm.slane %v582_v51, %v1699_v4 }
  0x1c   : > { %445 = vrot.lane.b32.xlu2 %v435_v5, %s1631_s22  ;;  %v214_v28 = vperm.slane %v208_v25, %v1718_v21  ;;  %v206_v29 = vperm.slane %v198_v26, %v1718_v21  ;;  %v1729_v30 = vperm.slane %v196_v27, %v1718_v21  ;;  %v586_v54 = vperm.slane %v580_v49, %v1699_v4 }
  0x1d   : > { %v594_v55 = vsel %vm171_vm0, %v1503_v38, %v593_v52  ;;  %v603_v56 = vrot.slane %v598_v50, 4  ;;  %v617_v58 = vrot.slane %v590_v53, 4  ;;  %v998_v62 = vsel %vm171_vm0, %v997_v59, %v1760_v42 }
  0x1e   : > { %240 = vrot.lane.b32.xlu1 %v214_v28, %s1634_s24  ;;  %232 = vrot.lane.b32.xlu0 %v206_v29, %s1635_s25  ;;  %v223_v31 = vrot.slane %v214_v28, 4  ;;  %v221_v32 = vrot.slane %v206_v29, 4  ;;  %v219_v33 = vrot.slane %v1729_v30, 4  ;;  %v602_v57 = vperm.slane %v594_v55, %v1699_v4 }
  0x1f   : > { %v1004_v63 = vperm.slane %v998_v62, %v1699_v4  ;;  %v604_v0 = vsel %vm171_vm0, %v603_v56, %v586_v54  ;;  %v209_v12 = vrot.slane %v1716_v20, 4  ;;  %v605_v14 = vrot.slane %v586_v54, 4 }
  0x20   : > { %v224_v34 = vsel %vm171_vm0, 0.0, %v223_v31  ;;  %v222_v35 = vsel %vm171_vm0, 0.0, %v221_v32  ;;  %v220_v36 = vsel %vm171_vm0, 0.0, %v219_v33  ;;  %v618_v60 = vsel %vm171_vm0, %v602_v57, %v617_v58 }
  0x21   : > { %v626_v1 = vperm.slane %v618_v60, %v1718_v21  ;;  %v1800_v6 = vperm.slane %v604_v0, %v1718_v21  ;;  %v210_v15 = vsel %vm171_vm0, %v1710_v16, %v209_v12  ;;  %v606_v19 = vsel %vm171_vm0, %v598_v50, %v605_v14 }
  0x22   : > { %v218_v17 = vperm.slane %v210_v15, %v1718_v21  ;;  %v614_v23 = vperm.slane %v606_v19, %v1718_v21  ;;  %v615_v25 = vrot.slane %v602_v57, 4 }
  0x23   : > { %v627_v10 = vrot.slane %v1800_v6, 4  ;;  %v633_v28 = vrot.slane %v626_v1, 4 }
  0x24   : > { %244 = vrot.lane.b32.xlu2 %v224_v34, %s1636_s26  ;;  %v225_v18 = vrot.slane %v218_v17, 4  ;;  %v629_v16 = vrot.slane %v614_v23, 4  ;;  %v616_v27 = vsel %vm171_vm0, %v615_v25, %v590_v53  ;;  %v999_v25 = vrot.slane %v1760_v42, 4 }
  0x25   : > { %v628_v13 = vsel %vm171_vm0, 0.0, %v627_v10  ;;  %v622_v29 = vperm.slane %v616_v27, %v1718_v21  ;;  %v634_v31 = vsel %vm171_vm0, 0.0, %v633_v28 }
  0x26   : > { %236 = vrot.lane.b32.xlu1 %v222_v35, %s1637_s27  ;;  %228 = vrot.lane.b32.xlu0 %v220_v36, %s1638_s28  ;;  %v226_v22 = vsel %vm171_vm0, 0.0, %v225_v18  ;;  %v630_v24 = vsel %vm171_vm0, 0.0, %v629_v16 }
  0x27   : > { %v631_v34 = vrot.slane %v622_v29, 4 }
  0x2c   : > { %441 = vrot.lane.b32.xlu2 %v166_v8, %s1631_s22 }
  0x2e   : > { %278 = vrot.lane.b32.xlu1 %v435_v5, %s1633_s23  ;;  %276 = vrot.lane.b32.xlu0 %v434_v2, %s1633_s23  ;;  %v986_v2 = vsel %vm171_vm0, %v985_v61, %v1769_v44  ;;  %v1009_v5 = vrot.slane %v1004_v63, 4 }
  0x2f   : > { %v992_v3 = vperm.slane %v986_v2, %v1699_v4 }
  0x31   : > { %v1010_v7 = vsel %vm171_vm0, %v1009_v5, %v992_v3  ;;  %v1011_v33 = vrot.slane %v992_v3, 4 }
  0x33   : > { %v1012_v35 = vsel %vm171_vm0, %v1004_v63, %v1011_v33 }
  0x34   : > { %1119 = vrot.lane.b32.xlu2 %v1744_v37, %s1633_s23  ;;  %v1835_v36 = vperm.slane %v1012_v35, %v1718_v21 }
  0x36   : > { %713 = vrot.lane.b32.xlu1 %v1503_v38, %s1633_s23  ;;  %274 = vrot.lane.b32.xlu0 %v166_v8, %s1633_s23  ;;  %v1805_v8 = vperm.slane %v1010_v7, %v1718_v21 }
  0x38   : > { %v1033_v9 = vrot.slane %v1805_v8, 4 }
  0x3a   : > { %v1034_v11 = vsel %vm171_vm0, 0.0, %v1033_v9 }
  0x3c   : > { %853 = vrot.lane.b32.xlu2 %v1503_v38, %s1631_s22 }
  0x3e   : > { %711 = vrot.lane.b32.xlu1 %v1502_v39, %s1633_s23  ;;  %709 = vrot.lane.b32.xlu0 %v1501_v40, %s1633_s23 }
  0x44   : > { %707 = vrot.lane.b32.xlu2 %v1507_v43, %s1633_s23 }
  0x46   : > { %1117 = vrot.lane.b32.xlu1 %v1757_v41, %s1633_s23  ;;  %1115 = vrot.lane.b32.xlu0 %v1760_v42, %s1633_s23 }
  0x4c   : > { %1113 = vrot.lane.b32.xlu2 %v1769_v44, %s1633_s23 }
  0x4e   : > { %849 = vrot.lane.b32.xlu0 %v1501_v40, %s1631_s22  ;;  %851 = vrot.lane.b32.xlu1 %v1502_v39, %s1631_s22  ;;  %v632_v39 = vsel %vm171_vm0, 0.0, %v631_v34 }
  0x54   : > { %1255 = vrot.lane.b32.xlu2 %v1760_v42, %s1631_s22 }
  0x56   : > { %847 = vrot.lane.b32.xlu0 %v1507_v43, %s1631_s22  ;;  %1259 = vrot.lane.b32.xlu1 %v1744_v37, %s1631_s22 }
  0x5c   : > { %656 = vrot.lane.b32.xlu2 %v626_v1, %s1639_s29 }
  0x5e   : > { %1257 = vrot.lane.b32.xlu0 %v1757_v41, %s1631_s22  ;;  %1253 = vrot.lane.b32.xlu1 %v1769_v44, %s1631_s22 }
  0x64   : > { %1042 = vrot.lane.b32.xlu2 %v1034_v11, %s1638_s28 }
  0x66   : > { %636 = vrot.lane.b32.xlu0 %v628_v13, %s1638_s28  ;;  %660 = vrot.lane.b32.xlu1 %v634_v31, %s1640_s30 }
  0x6c   : > { %252 = vrot.lane.b32.xlu2 %v226_v22, %s1640_s30 }
  0x6e   : > { %640 = vrot.lane.b32.xlu0 %v614_v23, %s1635_s25  ;;  %v448_v20 = vpop.permute.xlu2 %447  ;;  %1046 = vrot.lane.b32.xlu1 %v1835_v36, %s1635_s25 }
  0x6f   : > { %v465_v40 = vrot.slane %v448_v20, 4 }
  0x76   : > { %644 = vrot.lane.b32.xlu0 %v630_v24, %s1637_s27  ;;  %v446_v26 = vpop.permute.xlu2 %445 }
  0x77   : > { %v453_v38 = vrot.slane %v446_v26, 4 }
  0x7e   : > { %648 = vrot.lane.b32.xlu0 %v622_v29, %s1634_s24  ;;  %v245_v32 = vpop.permute.xlu2 %244 }
  0x86   : > { %v444_v43 = vpop.permute.xlu1 %443  ;;  %652 = vrot.lane.b32.xlu0 %v632_v39, %s1636_s26  ;;  %v442_v45 = vpop.permute.xlu2 %441 }
  0x87   : > { %v467_v46 = vrot.slane %v444_v43, 4  ;;  %v281_v47 = vpop.permute.xlu0 %280  ;;  %v454_v48 = vsel %vm171_vm0, %v453_v38, %v442_v45  ;;  %v455_v49 = vrot.slane %v442_v45, 4  ;;  %v466_v50 = vsel %vm171_vm0, %v465_v40, %v444_v43 }
  0x88   : > { %v460_v51 = vperm.slane %v454_v48, %v1699_v4  ;;  %v472_v56 = vperm.slane %v466_v50, %v1699_v4  ;;  %v1000_v43 = vsel %vm171_vm0, %v1744_v37, %v999_v25 }
  0x89   : > { %v468_v52 = vsel %vm171_vm0, %v448_v20, %v467_v46  ;;  %v456_v53 = vsel %vm171_vm0, %v446_v26, %v455_v49  ;;  %v298_v26 = vrot.slane %v281_v47, 4  ;;  %v1008_v48 = vperm.slane %v1000_v43, %v1699_v4 }
  0x8a   : > { %v476_v54 = vperm.slane %v468_v52, %v1699_v4  ;;  %v464_v55 = vperm.slane %v456_v53, %v1699_v4  ;;  %v479_v57 = vrot.slane %v460_v51, 4  ;;  %v477_v1 = vrot.slane %v472_v56, 4 }
  0x8c   : > { %v489_v58 = vrot.slane %v476_v54, 4  ;;  %v480_v61 = vsel %vm171_vm0, %v472_v56, %v479_v57  ;;  %v491_v62 = vrot.slane %v464_v55, 4  ;;  %v478_v5 = vsel %vm171_vm0, %v477_v1, %v460_v51 }
  0x8d   : > { %v488_v2 = vperm.slane %v480_v61, %v1718_v21  ;;  %v1865_v11 = vperm.slane %v478_v5, %v1718_v21 }
  0x8e   : > { %248 = vrot.lane.b32.xlu0 %v218_v17, %s1639_s29  ;;  %v490_v59 = vsel %vm171_vm0, %v489_v58, %v464_v55  ;;  %v492_v3 = vsel %vm171_vm0, %v476_v54, %v491_v62  ;;  %v1871_v13 = vpop.permute.xlu2 %1119 }
  0x8f   : > { %v1852_v60 = vperm.slane %v490_v59, %v1718_v21  ;;  %v1862_v7 = vperm.slane %v492_v3, %v1718_v21  ;;  %v501_v17 = vrot.slane %v1865_v11, 4  ;;  %v503_v16 = vrot.slane %v488_v2, 4 }
  0x90   : > { %v241_v63 = vpop.permute.xlu1 %240  ;;  %v233_v0 = vpop.permute.xlu0 %232  ;;  %v1021_v59 = vrot.slane %v1008_v48, 4 }
  0x91   : > { %522 = vrot.lane.b32.xlu2 %v1852_v60, %s1634_s24  ;;  %v502_v23 = vsel %vm171_vm0, 0.0, %v501_v17  ;;  %v504_v31 = vsel %vm171_vm0, 0.0, %v503_v16  ;;  %v505_v40 = vrot.slane %v1852_v60, 4  ;;  %v507_v5 = vrot.slane %v1862_v7, 4 }
  0x93   : > { %v506_v57 = vsel %vm171_vm0, 0.0, %v505_v40 }
  0x96   : > { %514 = vrot.lane.b32.xlu0 %v488_v2, %s1635_s25  ;;  %v1882_v20 = vpop.permute.xlu2 %853 }
  0x98   : > { %v237_v9 = vpop.permute.xlu1 %236  ;;  %v229_v10 = vpop.permute.xlu0 %228 }
  0x99   : > { %v256_v12 = vsel %vm255_vm1, %v1729_v30, %v229_v10  ;;  %530 = vrot.lane.b32.xlu2 %v1862_v7, %s1639_s29  ;;  %v1137_v10 = vrot.slane %v1871_v13, 4 }
  0x9a   : > { %v258_v14 = vsel %vm257_vm2, %v256_v12, %v233_v0 }
  0x9b   : > { %v260_v15 = vsel %vm259_vm3, %v258_v14, %v237_v9 }
  0x9c   : > { %v262_v18 = vsel %vm261_vm4, %v260_v15, %v241_v63 }
  0x9d   : > { %v1878_v19 = vsel %vm263_vm5, %v262_v18, %v245_v32  ;;  %v987_v32 = vrot.slane %v1769_v44, 4 }
  0x9e   : > { %v1902_v50 = vpop.permute.xlu2 %707 }
  0xa0   : > { %v279_v22 = vpop.permute.xlu1 %278  ;;  %v277_v30 = vpop.permute.xlu0 %276 }
  0xa1   : > { %510 = vrot.lane.b32.xlu2 %v502_v23, %s1638_s28  ;;  %v286_v24 = vrot.slane %v279_v22, 4  ;;  %v300_v27 = vrot.slane %v277_v30, 4  ;;  %v299_v33 = vsel %vm171_vm0, %v298_v26, %v277_v30  ;;  %v508_v23 = vsel %vm171_vm0, 0.0, %v507_v5 }
  0xa2   : > { %v305_v44 = vperm.slane %v299_v33, %v1699_v4 }
  0xa3   : > { %v301_v42 = vsel %vm171_vm0, %v281_v47, %v300_v27  ;;  %v988_v47 = vsel %vm171_vm0, %v1757_v41, %v987_v32 }
  0xa4   : > { %v309_v51 = vperm.slane %v301_v42, %v1699_v4  ;;  %v996_v54 = vperm.slane %v988_v47, %v1699_v4  ;;  %v310_v27 = vrot.slane %v305_v44, 4 }
  0xa6   : > { %v322_v61 = vrot.slane %v309_v51, 4  ;;  %v1022_v1 = vsel %vm171_vm0, %v1021_v59, %v996_v54  ;;  %v1938_v18 = vpop.permute.xlu2 %1113  ;;  %v1023_v42 = vrot.slane %v996_v54, 4 }
  0xa8   : > { %v1885_v28 = vpop.permute.xlu1 %713  ;;  %v275_v29 = vpop.permute.xlu0 %274  ;;  %v1967_v43 = vsel %vm171_vm0, %v1008_v48, %v1023_v42 }
  0xa9   : > { %v287_v34 = vsel %vm171_vm0, %v286_v24, %v275_v29  ;;  %v288_v35 = vrot.slane %v275_v29, 4  ;;  %518 = vrot.lane.b32.xlu2 %v504_v31, %s1637_s27  ;;  %v731_v49 = vrot.slane %v1885_v28, 4 }
  0xaa   : > { %v293_v38 = vperm.slane %v287_v34, %v1699_v4 }
  0xab   : > { %v289_v39 = vsel %vm171_vm0, %v279_v22, %v288_v35 }
  0xac   : > { %v297_v45 = vperm.slane %v289_v39, %v1699_v4  ;;  %v312_v46 = vrot.slane %v293_v38, 4  ;;  %v311_v35 = vsel %vm171_vm0, %v310_v27, %v293_v38 }
  0xae   : > { %v324_v52 = vrot.slane %v297_v45, 4  ;;  %v313_v53 = vsel %vm171_vm0, %v305_v44, %v312_v46  ;;  %v323_v9 = vsel %vm171_vm0, %v322_v61, %v297_v45  ;;  %v1973_v45 = vperm.slane %v311_v35, %v1718_v21 }
  0xaf   : > { %v1909_v37 = vperm.slane %v313_v53, %v1718_v21  ;;  %v1936_v17 = vperm.slane %v323_v9, %v1718_v21 }
  0xb0   : > { %v1912_v55 = vpop.permute.xlu1 %711  ;;  %v1914_v56 = vpop.permute.xlu0 %709  ;;  %v325_v58 = vsel %vm171_vm0, %v309_v51, %v324_v52  ;;  %v334_v52 = vrot.slane %v1973_v45, 4 }
  0xb1   : > { %v719_v41 = vrot.slane %v1912_v55, 4  ;;  %v732_v60 = vsel %vm171_vm0, %v731_v49, %v1914_v56  ;;  %526 = vrot.lane.b32.xlu2 %v506_v57, %s1636_s26  ;;  %347 = vrot.lane.b32.xlu1 %v1909_v37, %s1635_s25  ;;  %v333_v63 = vperm.slane %v325_v58, %v1718_v21  ;;  %v1979_v51 = vpop.permute.xlu2 %1255  ;;  %v338_v27 = vrot.slane %v1936_v17, 4 }
  0xb2   : > { %v738_v62 = vperm.slane %v732_v60, %v1699_v4  ;;  %v335_v58 = vsel %vm171_vm0, 0.0, %v334_v52  ;;  %v733_v60 = vrot.slane %v1914_v56, 4 }
  0xb3   : > { %v720_v0 = vsel %vm171_vm0, %v719_v41, %v1902_v50  ;;  %v340_v12 = vrot.slane %v333_v63, 4 }
  0xb4   : > { %v743_v2 = vrot.slane %v738_v62, 4  ;;  %v726_v3 = vperm.slane %v720_v0, %v1699_v4 }
  0xb5   : > { %v341_v15 = vsel %vm171_vm0, 0.0, %v340_v12 }
  0xb6   : > { %v744_v14 = vsel %vm171_vm0, %v743_v2, %v726_v3  ;;  %367 = vrot.lane.b32.xlu0 %v341_v15, %s1640_s30  ;;  %v745_v33 = vrot.slane %v726_v3, 4  ;;  %v336_v2 = vrot.slane %v1909_v37, 4  ;;  %v734_v3 = vsel %vm171_vm0, %v1885_v28, %v733_v60 }
  0xb7   : > { %v1941_v22 = vperm.slane %v744_v14, %v1718_v21  ;;  %v742_v12 = vperm.slane %v734_v3, %v1699_v4 }
  0xb8   : > { %v1944_v7 = vpop.permute.xlu1 %1117  ;;  %v1946_v30 = vpop.permute.xlu0 %1115  ;;  %v746_v49 = vsel %vm171_vm0, %v738_v62, %v745_v33  ;;  %v1996_v62 = vperm.slane %v1022_v1, %v1718_v21  ;;  %v721_v1 = vrot.slane %v1902_v50, 4  ;;  %v337_v28 = vsel %vm171_vm0, 0.0, %v336_v2 }
  0xb9   : > { %v1125_v16 = vrot.slane %v1944_v7, 4  ;;  %v1138_v24 = vsel %vm171_vm0, %v1137_v10, %v1946_v30  ;;  %534 = vrot.lane.b32.xlu2 %v508_v23, %s1640_s30  ;;  %355 = vrot.lane.b32.xlu1 %v1936_v17, %s1634_s24  ;;  %v767_v26 = vrot.slane %v1941_v22, 4  ;;  %v754_v48 = vperm.slane %v746_v49, %v1718_v21  ;;  %v2006_v5 = vpop.permute.xlu2 %656 }
  0xba   : > { %v1144_v25 = vperm.slane %v1138_v24, %v1699_v4  ;;  %v1037_v9 = vrot.slane %v1996_v62, 4  ;;  %v1139_v15 = vrot.slane %v1946_v30, 4  ;;  %v722_v50 = vsel %vm171_vm0, %v1912_v55, %v721_v1 }
  0xbb   : > { %v1126_v29 = vsel %vm171_vm0, %v1125_v16, %v1938_v18  ;;  %v768_v34 = vsel %vm171_vm0, 0.0, %v767_v26  ;;  %v769_v61 = vrot.slane %v754_v48, 4  ;;  %v755_v26 = vrot.slane %v742_v12, 4 }
  0xbc   : > { %v1149_v31 = vrot.slane %v1144_v25, 4  ;;  %v1132_v32 = vperm.slane %v1126_v29, %v1699_v4  ;;  %v1038_v23 = vsel %vm171_vm0, 0.0, %v1037_v9  ;;  %v1140_v29 = vsel %vm171_vm0, %v1871_v13, %v1139_v15 }
  0xbd   : > { %v770_v56 = vsel %vm171_vm0, 0.0, %v769_v61  ;;  %v730_v30 = vperm.slane %v722_v50, %v1699_v4  ;;  %v339_v17 = vsel %vm171_vm0, 0.0, %v338_v27 }
  0xbe   : > { %v1150_v39 = vsel %vm171_vm0, %v1149_v31, %v1132_v32  ;;  %776 = vrot.lane.b32.xlu0 %v768_v34, %s1638_s28  ;;  %v1151_v46 = vrot.slane %v1132_v32, 4  ;;  %v1127_v31 = vrot.slane %v1938_v18, 4  ;;  %v1148_v34 = vperm.slane %v1140_v29, %v1699_v4 }
  0xbf   : > { %v1964_v40 = vperm.slane %v1150_v39, %v1718_v21  ;;  %v756_v42 = vsel %vm171_vm0, %v755_v26, %v730_v30  ;;  %v1035_v18 = vrot.slane %v1835_v36, 4 }
  0xc0   : > { %v1970_v44 = vpop.permute.xlu0 %849  ;;  %v1984_v53 = vpop.permute.xlu1 %851  ;;  %v1152_v54 = vsel %vm171_vm0, %v1144_v25, %v1151_v46  ;;  %v1128_v39 = vsel %vm171_vm0, %v1944_v7, %v1127_v31  ;;  %v2044_v46 = vperm.slane %v756_v42, %v1718_v21  ;;  %v1161_v49 = vrot.slane %v1148_v34, 4 }
  0xc1   : > { %363 = vrot.lane.b32.xlu1 %v333_v63, %s1639_s29  ;;  %v1173_v38 = vrot.slane %v1964_v40, 4  ;;  %v859_v59 = vrot.slane %v1984_v53, 4  ;;  %v1160_v41 = vperm.slane %v1152_v54, %v1718_v21  ;;  %v871_v63 = vrot.slane %v1882_v20, 4  ;;  %v2031_v33 = vpop.permute.xlu2 %1042 }
  0xc2   : > { %v1036_v52 = vsel %vm171_vm0, 0.0, %v1035_v18  ;;  %v771_v36 = vrot.slane %v2044_v46, 4  ;;  %v873_v27 = vrot.slane %v1970_v44, 4 }
  0xc3   : > { %v1174_v47 = vsel %vm171_vm0, 0.0, %v1173_v38  ;;  %v872_v14 = vsel %vm171_vm0, %v871_v63, %v1970_v44  ;;  %v1175_v25 = vrot.slane %v1160_v41, 4  ;;  %v1069_v44 = vsel %vm255_vm1, %v1805_v8, %v2031_v33 }
  0xc4   : > { %1182 = vrot.lane.b32.xlu2 %v1174_v47, %s1638_s28  ;;  %v878_v16 = vperm.slane %v872_v14, %v1699_v4  ;;  %v2051_v47 = vperm.slane %v1967_v43, %v1718_v21  ;;  %v772_v43 = vsel %vm171_vm0, 0.0, %v771_v36 }
  0xc5   : > { %v1176_v32 = vsel %vm171_vm0, 0.0, %v1175_v25 }
  0xc6   : > { %780 = vrot.lane.b32.xlu0 %v754_v48, %s1635_s25  ;;  %v1136_v48 = vperm.slane %v1128_v39, %v1699_v4 }
  0xc8   : > { %v1988_v57 = vpop.permute.xlu0 %847  ;;  %v2046_v38 = vpop.permute.xlu1 %1259  ;;  %v1162_v54 = vsel %vm171_vm0, %v1161_v49, %v1136_v48  ;;  %v1163_v14 = vrot.slane %v1136_v48, 4 }
  0xc9   : > { %343 = vrot.lane.b32.xlu1 %v335_v58, %s1638_s28  ;;  %v860_v0 = vsel %vm171_vm0, %v859_v59, %v1988_v57  ;;  %v883_v58 = vrot.slane %v878_v16, 4  ;;  %v2060_v59 = vpop.permute.xlu2 %252  ;;  %v2064_v60 = vperm.slane %v1162_v54, %v1718_v21 }
  0xca   : > { %v866_v10 = vperm.slane %v860_v0, %v1699_v4  ;;  %v757_v0 = vrot.slane %v730_v30, 4  ;;  %v1164_v29 = vsel %vm171_vm0, %v1148_v34, %v1163_v14 }
  0xcb   : > { %v1177_v3 = vrot.slane %v2064_v60, 4 }
  0xcc   : > { %1186 = vrot.lane.b32.xlu2 %v1160_v41, %s1635_s25  ;;  %v885_v24 = vrot.slane %v866_v10, 4  ;;  %v884_v61 = vsel %vm171_vm0, %v883_v58, %v866_v10  ;;  %v758_v10 = vsel %vm171_vm0, %v742_v12, %v757_v0 }
  0xcd   : > { %v2075_v1 = vperm.slane %v884_v61, %v1718_v21  ;;  %v766_v25 = vperm.slane %v758_v10, %v1718_v21 }
  0xce   : > { %784 = vrot.lane.b32.xlu0 %v770_v56, %s1637_s27  ;;  %v886_v55 = vsel %vm171_vm0, %v878_v16, %v885_v24  ;;  %v1277_v56 = vrot.slane %v2046_v38, 4  ;;  %v861_v16 = vrot.slane %v1988_v57, 4 }
  0xcf   : > { %v894_v13 = vperm.slane %v886_v55, %v1718_v21  ;;  %v907_v24 = vrot.slane %v2075_v1, 4  ;;  %v1279_v55 = vrot.slane %v1979_v51, 4  ;;  %v773_v18 = vrot.slane %v766_v25, 4 }
  0xd0   : > { %v2015_v37 = vpop.permute.xlu0 %1257  ;;  %v2068_v63 = vpop.permute.xlu1 %1253  ;;  %v1278_v50 = vsel %vm171_vm0, %v1277_v56, %v1979_v51  ;;  %v862_v57 = vsel %vm171_vm0, %v1984_v53, %v861_v16 }
  0xd1   : > { %351 = vrot.lane.b32.xlu1 %v337_v28, %s1637_s27  ;;  %v909_v41 = vrot.slane %v894_v13, 4  ;;  %v1265_v28 = vrot.slane %v2015_v37, 4  ;;  %v1284_v26 = vperm.slane %v1278_v50, %v1699_v4  ;;  %v2112_v42 = vperm.slane %v862_v57, %v1699_v4 }
  0xd2   : > { %v774_v36 = vsel %vm171_vm0, 0.0, %v773_v18 }
  0xd3   : > { %v910_v2 = vsel %vm171_vm0, 0.0, %v909_v41  ;;  %v1266_v30 = vsel %vm171_vm0, %v1265_v28, %v2068_v63  ;;  %v1289_v34 = vrot.slane %v1284_v26, 4 }
  0xd4   : > { %1058 = vrot.lane.b32.xlu2 %v1038_v23, %s1636_s26  ;;  %v1178_v23 = vsel %vm171_vm0, 0.0, %v1177_v3  ;;  %v1272_v53 = vperm.slane %v1266_v30, %v1699_v4 }
  0xd6   : > { %1190 = vrot.lane.b32.xlu0 %v1176_v32, %s1637_s27  ;;  %v908_v32 = vsel %vm171_vm0, 0.0, %v907_v24  ;;  %v1290_v49 = vsel %vm171_vm0, %v1289_v34, %v1272_v53  ;;  %v1291_v56 = vrot.slane %v1272_v53, 4  ;;  %v1039_v24 = vrot.slane %v2051_v47, 4 }
  0xd7   : > { %v2134_v41 = vperm.slane %v1290_v49, %v1718_v21 }
  0xd8   : > { %v637_v35 = vpop.permute.xlu0 %636  ;;  %v661_v12 = vpop.permute.xlu1 %660 }
  0xd9   : > { %359 = vrot.lane.b32.xlu1 %v339_v17, %s1636_s26  ;;  %v874_v17 = vsel %vm171_vm0, %v1882_v20, %v873_v27  ;;  %v897_v20 = vrot.slane %v2112_v42, 4 }
  0xda   : > { %v882_v8 = vperm.slane %v874_v17, %v1699_v4 }
  0xdc   : > { %920 = vrot.lane.b32.xlu2 %v894_v13, %s1635_s25  ;;  %v898_v3 = vsel %vm171_vm0, %v882_v8, %v897_v20 }
  0xde   : > { %1062 = vrot.lane.b32.xlu0 %v2051_v47, %s1639_s29 }
  0xe0   : > { %v641_v7 = vpop.permute.xlu0 %640  ;;  %v1047_v39 = vpop.permute.xlu1 %1046 }
  0xe1   : > { %1050 = vrot.lane.b32.xlu1 %v1036_v52, %s1637_s27  ;;  %v2122_v48 = vsel %vm257_vm2, %v1069_v44, %v1047_v39  ;;  %v1280_v52 = vsel %vm171_vm0, %v2046_v38, %v1279_v55 }
  0xe2   : > { %v1288_v61 = vperm.slane %v1280_v52, %v1699_v4 }
  0xe4   : > { %792 = vrot.lane.b32.xlu2 %v772_v43, %s1636_s26  ;;  %v1267_v43 = vrot.slane %v2068_v63, 4  ;;  %v1301_v10 = vrot.slane %v1288_v61, 4 }
  0xe6   : > { %924 = vrot.lane.b32.xlu0 %v910_v2, %s1637_s27  ;;  %v1268_v63 = vsel %vm171_vm0, %v2015_v37, %v1267_v43  ;;  %v1292_v37 = vsel %vm171_vm0, %v1284_v26, %v1291_v56  ;;  %v895_v26 = vrot.slane %v882_v8, 4 }
  0xe7   : > { %v1276_v14 = vperm.slane %v1268_v63, %v1699_v4 }
  0xe8   : > { %v645_v9 = vpop.permute.xlu0 %644 }
  0xe9   : > { %1054 = vrot.lane.b32.xlu1 %v1996_v62, %s1634_s24  ;;  %v663_v62 = vsel %vm255_vm1, %v1800_v6, %v637_v35  ;;  %v1172_v35 = vperm.slane %v1164_v29, %v1718_v21  ;;  %v1302_v4 = vsel %vm171_vm0, %v1301_v10, %v1276_v14 }
  0xea   : > { %v664_v31 = vsel %vm257_vm2, %v663_v62, %v641_v7 }
  0xeb   : > { %v2081_v15 = vpop.permute.xlu2 %522  ;;  %v665_v13 = vsel %vm259_vm3, %v664_v31, %v645_v9  ;;  %v1179_v7 = vrot.slane %v1172_v35, 4  ;;  %v1313_v9 = vrot.slane %v2134_v41, 4 }
  0xec   : > { %1198 = vrot.lane.b32.xlu2 %v1178_v23, %s1636_s26 }
  0xed   : > { %v1180_v2 = vsel %vm171_vm0, 0.0, %v1179_v7  ;;  %v1314_v50 = vsel %vm171_vm0, 0.0, %v1313_v9 }
  0xee   : > { %796 = vrot.lane.b32.xlu0 %v766_v25, %s1639_s29  ;;  %v1040_v25 = vsel %vm171_vm0, 0.0, %v1039_v24 }
  0xf0   : > { %v649_v6 = vpop.permute.xlu0 %648 }
  0xf1   : > { %916 = vrot.lane.b32.xlu1 %v908_v32, %s1638_s28  ;;  %v666_v33 = vsel %vm261_vm4, %v665_v13, %v649_v6 }
  0xf3   : > { %v2115_v51 = vpop.permute.xlu2 %530 }
  0xf4   : > { %1202 = vrot.lane.b32.xlu2 %v1172_v35, %s1639_s29 }
  0xf6   : > { %800 = vrot.lane.b32.xlu0 %v774_v36, %s1640_s30 }
  0xf8   : > { %v653_v54 = vpop.permute.xlu0 %652 }
  0xf9   : > { %v667_v58 = vsel %vm263_vm5, %v666_v33, %v653_v54  ;;  %788 = vrot.lane.b32.xlu1 %v2044_v46, %s1634_s24 }
  0xfa   : > { %v668_v38 = vsel %vm265_vm6, %v667_v58, %v2006_v5  ;;  %v906_v5 = vperm.slane %v898_v3, %v1718_v21 }
  0xfb   : > { %v511_v0 = vpop.permute.xlu2 %510  ;;  %v669_v46 = vsel %vm267_vm7, %v668_v38, %v661_v12  ;;  %v1303_v12 = vrot.slane %v1276_v14, 4 }
  0xfc   : > { %1206 = vrot.lane.b32.xlu2 %v1180_v2, %s1640_s30  ;;  %1498 = vmatpush.msk.msra.mxu3 %vm383_vm8, %v669_v46  ;;  %v913_v18 = vrot.slane %v906_v5, 4 }
  0xfd   : > { %v1304_v27 = vsel %vm171_vm0, %v1288_v61, %v1303_v12 }
  0xfe   : > { %936 = vrot.lane.b32.xlu0 %v906_v5, %s1639_s29  ;;  %v1312_v6 = vperm.slane %v1304_v27, %v1718_v21  ;;  %v914_v39 = vsel %vm171_vm0, 0.0, %v913_v18 }
 0x100   : > { %v249_v28 = vpop.permute.xlu0 %248  ;;  %v1319_v34 = vrot.slane %v1312_v6, 4 }
 0x101   : > { %v266_v23 = vsel %vm265_vm6, %v1878_v19, %v249_v28  ;;  %1194 = vrot.lane.b32.xlu1 %v2064_v60, %s1634_s24  ;;  %v1300_v19 = vperm.slane %v1292_v37, %v1718_v21  ;;  %v1308_v60 = vperm.slane %v1302_v4, %v1718_v21 }
 0x102   : > { %v268_v16 = vsel %vm267_vm7, %v266_v23, %v2060_v59  ;;  %v537_v59 = vsel %vm255_vm1, %v1865_v11, %v511_v0  ;;  %v896_v11 = vsel %vm171_vm0, %v895_v26, %v2112_v42  ;;  %v1320_v17 = vsel %vm171_vm0, 0.0, %v1319_v34  ;;  %v1489_v34 = vld [vmem:[%s2305_s0 + $0x10] sm:$0xff] }
 0x103   : > { %v519_v62 = vpop.permute.xlu2 %518  ;;  %1487 = vmatpush.msk.msra.mxu1 %vm383_vm8, %v268_v16  ;;  %v1317_v30 = vrot.slane %v1308_v60, 4  ;;  %v902_v44 = vperm.slane %v896_v11, %v1718_v21  ;;  %v1315_v33 = vrot.slane %v1300_v19, 4 }
 0x104   : > { %1322 = vrot.lane.b32.xlu2 %v1314_v50, %s1638_s28  ;;  %s1481_s28 = sshll.u32 %s2319_s10, 1 }
 0x105   : > { %v1318_v55 = vsel %vm171_vm0, 0.0, %v1317_v30  ;;  %v911_v13 = vrot.slane %v902_v44, 4 }
 0x106   : > { %1326 = vrot.lane.b32.xlu0 %v1300_v19, %s1635_s25 }
 0x107   : > { %v912_v21 = vsel %vm171_vm0, 0.0, %v911_v13 }
 0x108   : > { %v515_v47 = vpop.permute.xlu0 %514 }
 0x109   : > { %v538_v29 = vsel %vm257_vm2, %v537_v59, %v515_v47  ;;  %1066 = vrot.lane.b32.xlu1 %v1040_v25, %s1640_s30 }
 0x10a   : > { %v539_v57 = vsel %vm259_vm3, %v538_v29, %v519_v62 }
 0x10b   : > { %v527_v31 = vpop.permute.xlu2 %526  ;;  %v540_v32 = vsel %vm261_vm4, %v539_v57, %v2081_v15 }
 0x10c   : > { %1334 = vrot.lane.b32.xlu2 %v1308_v60, %s1634_s24  ;;  %v541_v35 = vsel %vm263_vm5, %v540_v32, %v527_v31 }
 0x10d   : > { %v542_v42 = vsel %vm265_vm6, %v541_v35, %v2115_v51  ;;  %v1316_v51 = vsel %vm171_vm0, 0.0, %v1315_v33  ;;  %v1526_v33 = vld [vmem:[%s2305_s0 + $0x38] sm:$0xff] }
 0x10e   : > { %1338 = vrot.lane.b32.xlu0 %v1318_v55, %s1636_s26 }
 0x111   : > { %928 = vrot.lane.b32.xlu1 %v902_v44, %s1634_s24 }
 0x113   : > { %v535_v53 = vpop.permute.xlu2 %534 }
 0x114   : > { %1346 = vrot.lane.b32.xlu2 %v1320_v17, %s1640_s30  ;;  %v543_v15 = vsel %vm267_vm7, %v542_v42, %v535_v53  ;;  %v1484_v17 = vld [vmem:[%s2305_s0 + $0x8] sm:$0xff]  ;;  %v1497_v42 = vld [vmem:[%s2305_s0 + $0x18] sm:$0xff] }
 0x115   : > { %1490 = vmatpush.msk.msra.mxu2 %vm383_vm8, %v543_v15  ;;  %1499 = vmatmul.msk.f32.vlgmr.msra.gmra.mxu3 %vm379_vm9, %v1497_v42  ;;  %v269_v15 = vld [vmem:[%s2305_s0] sm:$0xff] }
 0x116   : > { %1491 = vmatmul.msk.f32.vlgmr.msra.gmra.mxu2 %vm379_vm9, %v1489_v34  ;;  %1488 = vmatmul.msk.f32.vlgmr.msra.gmra.mxu1 %vm379_vm9, %v269_v15 }
 0x119   : > { %932 = vrot.lane.b32.xlu1 %v912_v21, %s1636_s26 }
 0x11e   : > { %v1183_v52 = vpop.permute.xlu2 %1182 }
 0x121   : > { %940 = vrot.lane.b32.xlu1 %v914_v39, %s1640_s30  ;;  %v1519_v39 = vld [vmem:[%s2305_s0 + $0x30] sm:$0xff] }
 0x123   : > { %v348_v8 = vpop.permute.xlu1 %347 }
 0x126   : > { %v1187_v54 = vpop.permute.xlu2 %1186 }
 0x128   : > { %v368_v49 = vpop.permute.xlu0 %367 }
 0x129   : > { %1330 = vrot.lane.b32.xlu1 %v1316_v51, %s1637_s27 }
 0x12b   : > { %v356_v20 = vpop.permute.xlu1 %355 }
 0x12e   : > { %v1059_v0 = vpop.permute.xlu2 %1058 }
 0x130   : > { %v777_v36 = vpop.permute.xlu0 %776 }
 0x131   : > { %1342 = vrot.lane.b32.xlu1 %v1312_v6, %s1639_s29  ;;  %v803_v12 = vsel %vm255_vm1, %v1941_v22, %v777_v36  ;;  %v1209_v22 = vsel %vm255_vm1, %v1964_v40, %v1183_v52  ;;  %s161_s29 = sadd.s32 %s1481_s28, %s2321_s9 }
 0x132   : > { %v1210_v57 = vsel %vm257_vm2, %v1209_v22, %v1187_v54  ;;  %s1482_s30 = sshll.u32 %s161_s29, 3 }
 0x133   : > { %v364_v7 = vpop.permute.xlu1 %363  ;;  %s163_s5 = scalar_lea.vmem %s2307_s2, %s1482_s30 }
 0x136   : > { %v921_v14 = vpop.permute.xlu2 %920 }
 0x138   : > { %v781_v58 = vpop.permute.xlu0 %780 }
 0x139   : > { %v804_v19 = vsel %vm257_vm2, %v803_v12, %v781_v58 }
 0x13b   : > { %v344_v43 = vpop.permute.xlu1 %343 }
 0x13c   : > { %v370_v2 = vsel %vm255_vm1, %v1973_v45, %v344_v43 }
 0x13d   : > { %v371_v3 = vsel %vm257_vm2, %v370_v2, %v348_v8  ;;  %v1504_v8 = vld [vmem:[%s2305_s0 + $0x20] sm:$0xff] }
 0x13e   : > { %v793_v45 = vpop.permute.xlu2 %792 }
 0x140   : > { %v785_v61 = vpop.permute.xlu0 %784 }
 0x141   : > { %v805_v60 = vsel %vm259_vm3, %v804_v19, %v785_v61 }
 0x143   : > { %v352_v38 = vpop.permute.xlu1 %351 }
 0x144   : > { %v372_v46 = vsel %vm259_vm3, %v371_v3, %v352_v38 }
 0x145   : > { %v373_v56 = vsel %vm261_vm4, %v372_v46, %v356_v20 }
 0x146   : > { %v1199_v24 = vpop.permute.xlu2 %1198 }
 0x148   : > { %v1191_v63 = vpop.permute.xlu0 %1190 }
 0x149   : > { %v1211_v31 = vsel %vm259_vm3, %v1210_v57, %v1191_v63 }
 0x14b   : > { %v360_v9 = vpop.permute.xlu1 %359 }
 0x14c   : > { %v374_v10 = vsel %vm263_vm5, %v373_v56, %v360_v9 }
 0x14d   : > { %v375_v5 = vsel %vm265_vm6, %v374_v10, %v364_v7 }
 0x14e   : > { %v376_v28 = vsel %vm267_vm7, %v375_v5, %v368_v49  ;;  %v1203_v26 = vpop.permute.xlu2 %1202 }
 0x14f   : > { %1485 = vmatpush.msk.msra.mxu0 %vm383_vm8, %v376_v28 }
 0x150   : > { %v1063_v23 = vpop.permute.xlu0 %1062  ;;  %1486 = vmatmul.msk.f32.vlgmr.msra.gmra.mxu0 %vm379_vm9, %v1484_v17 }
 0x153   : > { %v1051_v50 = vpop.permute.xlu1 %1050 }
 0x154   : > { %v1071_v11 = vsel %vm259_vm3, %v2122_v48, %v1051_v50 }
 0x156   : > { %v1207_v40 = vpop.permute.xlu2 %1206 }
 0x158   : > { %v925_v37 = vpop.permute.xlu0 %924 }
 0x15b   : > { %v1055_v16 = vpop.permute.xlu1 %1054 }
 0x15c   : > { %v1072_v55 = vsel %vm261_vm4, %v1071_v11, %v1055_v16 }
 0x15d   : > { %v1073_v48 = vsel %vm263_vm5, %v1072_v55, %v1059_v0  ;;  %v1511_v0 = vld [vmem:[%s2305_s0 + $0x28] sm:$0xff] }
 0x15e   : > { %v1074_v21 = vsel %vm265_vm6, %v1073_v48, %v1063_v23  ;;  %v1323_v58 = vpop.permute.xlu2 %1322 }
 0x15f   : > { %v1349_v46 = vsel %vm255_vm1, %v2134_v41, %v1323_v58 }
 0x160   : > { %v797_v62 = vpop.permute.xlu0 %796 }
 0x163   : > { %v917_v4 = vpop.permute.xlu1 %916 }
 0x164   : > { %v943_v49 = vsel %vm255_vm1, %v2075_v1, %v917_v4 }
 0x165   : > { %v944_v20 = vsel %vm257_vm2, %v943_v49, %v921_v14 }
 0x166   : > { %v945_v7 = vsel %vm259_vm3, %v944_v20, %v925_v37  ;;  %v1335_v3 = vpop.permute.xlu2 %1334 }
 0x168   : > { %v801_v27 = vpop.permute.xlu0 %800 }
 0x16b   : > { %v789_v25 = vpop.permute.xlu1 %788 }
 0x16c   : > { %v806_v59 = vsel %vm261_vm4, %v805_v60, %v789_v25 }
 0x16d   : > { %v807_v47 = vsel %vm263_vm5, %v806_v59, %v793_v45  ;;  %v1533_v45 = vld [vmem:[%s2305_s0 + $0x40] sm:$0xff] }
 0x16e   : > { %v808_v29 = vsel %vm265_vm6, %v807_v47, %v797_v62  ;;  %v1347_v23 = vpop.permute.xlu2 %1346 }
 0x16f   : > { %v809_v30 = vsel %vm267_vm7, %v808_v29, %v801_v27 }
 0x170   : > { %1505 = vmatpush.msk.msrb.mxu0 %vm383_vm8, %v809_v30  ;;  %v937_v36 = vpop.permute.xlu0 %936 }
 0x171   : > { %1506 = vmatmul.msk.f32.vlgmr.msrb.gmra.mxu0 %vm379_vm9, %v1504_v8 }
 0x173   : > { %v1195_v6 = vpop.permute.xlu1 %1194 }
 0x174   : > { %v1212_v32 = vsel %vm261_vm4, %v1211_v31, %v1195_v6 }
 0x175   : > { %v1213_v44 = vsel %vm263_vm5, %v1212_v32, %v1199_v24 }
 0x176   : > { %v1214_v35 = vsel %vm265_vm6, %v1213_v44, %v1203_v26 }
 0x177   : > { %v1215_v53 = vsel %vm267_vm7, %v1214_v35, %v1207_v40 }
 0x178   : > { %1527 = vmatpush.msk.msrb.mxu3 %vm383_vm8, %v1215_v53  ;;  %v1327_v2 = vpop.permute.xlu0 %1326 }
 0x179   : > { %1528 = vmatmul.msk.f32.vlgmr.msrb.gmra.mxu3 %vm379_vm9, %v1526_v33  ;;  %v1350_v56 = vsel %vm257_vm2, %v1349_v46, %v1327_v2 }
 0x17b   : > { %v1067_v13 = vpop.permute.xlu1 %1066 }
 0x17c   : > { %v1075_v18 = vsel %vm267_vm7, %v1074_v21, %v1067_v13 }
 0x17d   : > { %1520 = vmatpush.msk.msrb.mxu2 %vm383_vm8, %v1075_v18 }
 0x17e   : > { %1521 = vmatmul.msk.f32.vlgmr.msrb.gmra.mxu2 %vm379_vm9, %v1519_v39 }
 0x180   : > { %v1339_v5 = vpop.permute.xlu0 %1338 }
 0x183   : > { %v929_v51 = vpop.permute.xlu1 %928 }
 0x184   : > { %v946_v54 = vsel %vm261_vm4, %v945_v7, %v929_v51 }
 0x18b   : > { %v933_v52 = vpop.permute.xlu1 %932 }
 0x18c   : > { %v947_v43 = vsel %vm263_vm5, %v946_v54, %v933_v52 }
 0x18d   : > { %v948_v38 = vsel %vm265_vm6, %v947_v43, %v937_v36 }
 0x193   : > { %v941_v61 = vpop.permute.xlu1 %940  ;;  %v430_v37 = vpop.f32.mrf.mxu1 }
 0x194   : > { %v949_v1 = vsel %vm267_vm7, %v948_v38, %v941_v61 }
 0x195   : > { %1512 = vmatpush.msk.msrb.mxu1 %vm383_vm8, %v949_v1 }
 0x196   : > { %1513 = vmatmul.msk.f32.vlgmr.msrb.gmra.mxu1 %vm379_vm9, %v1511_v0 }
 0x198   : > { %v695_v12 = vpop.f32.mrf.mxu3 }
 0x199   : > { %v569_v4 = vpop.f32.mrf.mxu2 }
 0x19b   : > { %v1331_v63 = vpop.permute.xlu1 %1330 }
 0x19c   : > { %v1351_v9 = vsel %vm259_vm3, %v1350_v56, %v1331_v63 }
 0x19d   : > { %v1352_v10 = vsel %vm261_vm4, %v1351_v9, %v1335_v3 }
 0x19e   : > { %v1353_v28 = vsel %vm263_vm5, %v1352_v10, %v1339_v5 }
 0x1a3   : > { %v1343_v14 = vpop.permute.xlu1 %1342 }
 0x1a4   : > { %v1354_v50 = vsel %vm265_vm6, %v1353_v28, %v1343_v14 }
 0x1a5   : > { %v1355_v41 = vsel %vm267_vm7, %v1354_v50, %v1347_v23 }
 0x1a6   : > { %1534 = vmatpush.msk.msra.mxu0 %vm383_vm8, %v1355_v41 }
 0x1a7   : > { %1535 = vmatmul.msk.f32.vlgmr.msra.gmra.mxu0 %vm379_vm9, %v1533_v45 }
 0x1cd   : > { %v404_v16 = vpop.f32.mrf.mxu0 }
 0x1ce   : > { %v431_v24 = vadd.f32 %v430_v37, %v404_v16 }
 0x1d0   : > { %v572_v62 = vadd.f32 %v569_v4, %v431_v24 }
 0x1d2   : > { %v698_v19 = vadd.f32 %v695_v12, %v572_v62 }
 0x1ee   : > { %v835_v60 = vpop.f32.mrf.mxu0 }
 0x1ef   : > { %v838_v25 = vadd.f32 %v835_v60, %v698_v19 }
 0x1fc   : > { %v1241_v29 = vpop.f32.mrf.mxu3 }
 0x201   : > { %v1101_v47 = vpop.f32.mrf.mxu2 }
 0x213   : > { %v975_v26 = vpop.f32.mrf.mxu1 }
 0x214   : > { %v978_v59 = vadd.f32 %v975_v26, %v838_v25 }
 0x216   : > { %v1104_v27 = vadd.f32 %v1101_v47, %v978_v59 }
 0x218   : > { %v1244_v30 = vadd.f32 %v1241_v29, %v1104_v27 }
 0x224   : > { %v1381_v22 = vpop.f32.mrf.mxu0 }
 0x225   : > { %v1384_v57 = vadd.f32 %v1381_v22, %v1244_v30 }
 0x227   : > { %v1385_v31 = vmax.f32 %v1384_v57, 0.0 }
 0x229   : > { %1386 = vst [vmem:[%s163_s5] sm:$0xff] %v1385_v31 }
 0x22a PF: > { %s12_s13 = sadd.s32 1, %s1628_s13   ;;  %s2308_s9 = smov %s1620_s11 }
 0x22b   : > { %p9_p7 = scmp.ge.s32.totalorder %s12_s13, 6   ;;  %s2309_s10 = smov %s1624_s12 }
 0x22c   : > { %s2310_s11 = smov %s2313_s14  ;;  %s2311_s12 = smov %s2317_s15 }
 0x22d   :  { %11 = sbr.rel (!%p9_p7) target bundleno = 3 (0x3), region = 69 }

</bundles_post_ra>
